<compile_context>
chip_gen: v6e
topology: v6e:2x2x1
jax: 0.10.0
libtpu: 0.0.40
codegen_flags: <defaults>
</compile_context>

<pallas_src>
import functools

import numpy as np
import jax
import jax.numpy as jnp
from jax.experimental import pallas as pl
from jax.experimental.pallas import tpu as pltpu

LANE = 128


def mhsa_kernel(x_ref, wqkv_ref, bqkv_ref, wfc_ref, bfc_ref, o_ref, *,
                b, seq, n_head, d_k, d_v):
    # x_ref: (b*S, d_model) f32 -- whole problem in a single grid step.
    x = x_ref[...].astype(jnp.bfloat16)

    # --- fused, lane-dense Q/K/V projection: bf16 weights, f32 accumulation ---
    # wqkv_ref is pre-packed/padded to (d_model, 128); 1/sqrt(d_k) is already
    # folded into the q columns (and bqkv's q lanes).
    qkv = jnp.dot(x, wqkv_ref[...],
                  preferred_element_type=jnp.float32) + bqkv_ref[...]

    Hk = n_head * d_k
    Hv = n_head * d_v
    q_all = qkv[:, :Hk]
    k_all = qkv[:, Hk:2 * Hk]
    v_all = qkv[:, 2 * Hk:2 * Hk + Hv]

    wfc = wfc_ref[...]                      # (Hv, 128) bf16, pre-cast/padded

    # Static (unrolled) loops over batch and head; all slices are static
    # sublane/lane windows, no transposes.
    for bi in range(b):
        rows = slice(bi * seq, (bi + 1) * seq)
        ctx_heads = []
        for h in range(n_head):
            q = q_all[rows, h * d_k:(h + 1) * d_k].astype(jnp.bfloat16)
            k = k_all[rows, h * d_k:(h + 1) * d_k].astype(jnp.bfloat16)
            v = v_all[rows, h * d_v:(h + 1) * d_v].astype(jnp.bfloat16)

            # scores: (S, S) = q @ k^T (contract last dims, no transpose op);
            # scale already baked into q via the packed weights.
            att = jax.lax.dot_general(
                q, k, (((1,), (1,)), ((), ())),
                preferred_element_type=jnp.float32)

            # max-stabilized softmax over the key axis, all f32 VPU/EUP math;
            # exact reciprocal for close parity with the reference softmax.
            att_max = jnp.max(att, axis=-1, keepdims=True)
            p = jnp.exp(att - att_max)
            att = p * pl.reciprocal(jnp.sum(p, axis=-1, keepdims=True),
                                    approx=False)

            ctx_heads.append(
                jnp.dot(att.astype(jnp.bfloat16), v,
                        preferred_element_type=jnp.float32))         # (S, d_v)

        # Stage all heads contiguously along lanes -> ONE output-projection
        # matmul per batch: (S, H*d_v) @ (H*d_v, 128), K = H*d_v.
        ctx_all = jnp.concatenate(ctx_heads, axis=-1).astype(jnp.bfloat16)
        out_b = jnp.dot(ctx_all, wfc,
                        preferred_element_type=jnp.float32) + bfc_ref[...]

        o_ref[rows, :] = out_b.astype(o_ref.dtype)   # unmasked, lane-dense vst


def pack_params(params, *, n_head, d_k, d_v):
    """One-time parameter packing (hoisted out of the per-forward call path).

    - Concatenate wq|wk|wv (and biases) into a single fused-projection matrix.
    - Fold 1/sqrt(d_k) into the q weight AND q bias columns.
    - Zero-pad both the fused QKV projection and the output projection to a
      128-lane-dense width (unmasked vregs / stores in the kernel).
    - Pre-cast weights to bf16; keep biases f32 (added to f32 accumulators).
    """
    wq, bq, wk, bk, wv, bv, wfc, bfc = params
    d_model = wq.shape[0]
    scale = np.float32(1.0 / np.sqrt(d_k))

    wqkv = jnp.concatenate([wq * scale, wk, wv], axis=1)   # (d_model, 2Hk+Hv)
    bqkv = jnp.concatenate([bq * scale, bk, bv], axis=1)   # (1, 2Hk+Hv)

    qkv_w = wqkv.shape[1]
    qkv_wp = ((qkv_w + LANE - 1) // LANE) * LANE
    d_out_p = ((d_model + LANE - 1) // LANE) * LANE

    wqkv_p = (jnp.zeros((d_model, qkv_wp), jnp.float32)
              .at[:, :qkv_w].set(wqkv).astype(jnp.bfloat16))
    bqkv_p = jnp.zeros((1, qkv_wp), jnp.float32).at[:, :qkv_w].set(bqkv)

    wfc_p = (jnp.zeros((wfc.shape[0], d_out_p), jnp.float32)
             .at[:, :d_model].set(wfc).astype(jnp.bfloat16))
    bfc_p = jnp.zeros((1, d_out_p), jnp.float32).at[:, :d_model].set(bfc)

    return wqkv_p, bqkv_p, wfc_p, bfc_p


@functools.partial(jax.jit, static_argnames=("n_head", "d_k", "d_v"))
def multi_head_self_attention(x, packed_params, *, n_head, d_k, d_v):
    """x: (b, S, d_model) f32; packed_params from pack_params(). -> (b, S, d_model)."""
    b, S, d_model = x.shape
    wqkv_p, bqkv_p, wfc_p, bfc_p = packed_params
    d_out_p = wfc_p.shape[1]

    x2 = x.reshape(b * S, d_model)

    kernel = functools.partial(mhsa_kernel, b=b, seq=S,
                               n_head=n_head, d_k=d_k, d_v=d_v)

    out = pl.pallas_call(
        kernel,
        out_shape=jax.ShapeDtypeStruct((b * S, d_out_p), jnp.float32),
        grid_spec=pltpu.PrefetchScalarGridSpec(
            num_scalar_prefetch=0,
            grid=(1,),                                # single step: toy shapes
            in_specs=[
                pl.BlockSpec((b * S, d_model), lambda i: (0, 0)),   # x
                pl.BlockSpec(wqkv_p.shape, lambda i: (0, 0)),
                pl.BlockSpec(bqkv_p.shape, lambda i: (0, 0)),
                pl.BlockSpec(wfc_p.shape, lambda i: (0, 0)),
                pl.BlockSpec(bfc_p.shape, lambda i: (0, 0)),
            ],
            out_specs=pl.BlockSpec((b * S, d_out_p), lambda i: (0, 0)),
        ),
        compiler_params=pltpu.CompilerParams(
            dimension_semantics=("arbitrary",)),
    )(x2, wqkv_p, bqkv_p, wfc_p, bfc_p)

    return out[:, :d_model].reshape(b, S, d_model)


def init_params(key, n_head, d_model, d_k, d_v):
    """Deterministic init mirroring the PyTorch module's __init__.

    Weights are stored as (in_features, out_features) so the kernel does x @ W.
    """
    ks = jax.random.split(key, 8)
    std_qk = np.sqrt(2.0 / (d_model + d_k))
    std_v = np.sqrt(2.0 / (d_model + d_v))
    std_fc = np.sqrt(2.0 / (n_head * d_v + d_model))   # xavier_normal_

    wq = std_qk * jax.random.normal(ks[0], (d_model, n_head * d_k), jnp.float32)
    wk = std_qk * jax.random.normal(ks[1], (d_model, n_head * d_k), jnp.float32)
    wv = std_v * jax.random.normal(ks[2], (d_model, n_head * d_v), jnp.float32)
    wfc = std_fc * jax.random.normal(ks[3], (n_head * d_v, d_model), jnp.float32)

    # nn.Linear default bias init: U(-1/sqrt(fan_in), 1/sqrt(fan_in))
    bnd = 1.0 / np.sqrt(d_model)
    bq = jax.random.uniform(ks[4], (1, n_head * d_k), jnp.float32, -bnd, bnd)
    bk = jax.random.uniform(ks[5], (1, n_head * d_k), jnp.float32, -bnd, bnd)
    bv = jax.random.uniform(ks[6], (1, n_head * d_v), jnp.float32, -bnd, bnd)
    bnd_fc = 1.0 / np.sqrt(n_head * d_v)
    bfc = jax.random.uniform(ks[7], (1, d_model), jnp.float32, -bnd_fc, bnd_fc)

    return (wq, bq, wk, bk, wv, bv, wfc, bfc)


def reference_jax(x, params, n_head, d_k, d_v):
    """Plain-JAX (f32) reproduction of the PyTorch forward (eval mode)."""
    wq, bq, wk, bk, wv, bv, wfc, bfc = params
    b, S, _ = x.shape
    q = (x @ wq + bq[0]).reshape(b, S, n_head, d_k)
    k = (x @ wk + bk[0]).reshape(b, S, n_head, d_k)
    v = (x @ wv + bv[0]).reshape(b, S, n_head, d_v)
    q = jnp.transpose(q, (2, 0, 1, 3)).reshape(-1, S, d_k)
    k = jnp.transpose(k, (2, 0, 1, 3)).reshape(-1, S, d_k)
    v = jnp.transpose(v, (2, 0, 1, 3)).reshape(-1, S, d_v)
    att = jnp.einsum('nqd,nkd->nqk', q, k) / np.sqrt(d_k)
    att = jax.nn.softmax(att, axis=2)
    r = jnp.einsum('nqk,nkd->nqd', att, v)
    r = r.reshape(n_head, b, S, d_v).transpose(1, 2, 0, 3).reshape(b, S, n_head * d_v)
    return r @ wfc + bfc[0]


if __name__ == "__main__":
    n_head, d_model, d_k, d_v = 4, 32, 8, 8
    b, seq = 2, 8

    key = jax.random.PRNGKey(0)
    kx, kp = jax.random.split(key)
    x = jax.random.normal(kx, (b, seq, d_model), jnp.float32)
    params = init_params(kp, n_head, d_model, d_k, d_v)

    # One-time packing (concat + 128-lane pad + bf16 cast + 1/sqrt(d_k) fold);
    # the per-forward path only reshapes x and calls the kernel.
    packed = pack_params(params, n_head=n_head, d_k=d_k, d_v=d_v)
    packed = jax.block_until_ready(packed)

    out = multi_head_self_attention(x, packed, n_head=n_head, d_k=d_k, d_v=d_v)
    out = jax.block_until_ready(out)

    ref = reference_jax(x, params, n_head, d_k, d_v)
    # Tolerance reflects bf16 MXU inputs (f32 accumulation everywhere).
    np.testing.assert_allclose(np.asarray(out), np.asarray(ref),
                               rtol=5e-2, atol=5e-2)
    print("KERNEL_OK")
</pallas_src>

<mosaic_0001>
module attributes {stable_mosaic.version = 11 : i64} {
  func.func @mhsa_kernel(%arg0: i32, %arg1: memref<16x32xf32, #tpu.memory_space<vmem>>, %arg2: memref<32x128xbf16, #tpu.memory_space<vmem>>, %arg3: memref<1x128xf32, #tpu.memory_space<vmem>>, %arg4: memref<32x128xbf16, #tpu.memory_space<vmem>>, %arg5: memref<1x128xf32, #tpu.memory_space<vmem>>, %arg6: memref<16x128xf32, #tpu.memory_space<vmem>>) attributes {dimension_semantics = [#tpu.dimension_semantics<arbitrary>], iteration_bounds = array<i64: 1>, scalar_prefetch = 0 : i64, scratch_operands = 0 : i64, tpu.core_type = #tpu.core_type<tc>, window_params = [{pipeline_mode = #tpu.pipeline_mode<synchronous>, transform_indices = @transform_0, window_bounds = array<i64: 16, 32>}, {pipeline_mode = #tpu.pipeline_mode<synchronous>, transform_indices = @transform_1, window_bounds = array<i64: 32, 128>}, {pipeline_mode = #tpu.pipeline_mode<synchronous>, transform_indices = @transform_2, window_bounds = array<i64: 1, 128>}, {pipeline_mode = #tpu.pipeline_mode<synchronous>, transform_indices = @transform_3, window_bounds = array<i64: 32, 128>}, {pipeline_mode = #tpu.pipeline_mode<synchronous>, transform_indices = @transform_4, window_bounds = array<i64: 1, 128>}, {pipeline_mode = #tpu.pipeline_mode<synchronous>, transform_indices = @transform_5, window_bounds = array<i64: 16, 128>}]} {
    %c0 = arith.constant 0 : index
    %c0_0 = arith.constant 0 : index
    %0 = vector.load %arg1[%c0, %c0_0] : memref<16x32xf32, #tpu.memory_space<vmem>>, vector<16x32xf32>
    %1 = arith.truncf %0 : vector<16x32xf32> to vector<16x32xbf16>
    %c0_1 = arith.constant 0 : index
    %c0_2 = arith.constant 0 : index
    %2 = vector.load %arg2[%c0_1, %c0_2] : memref<32x128xbf16, #tpu.memory_space<vmem>>, vector<32x128xbf16>
    %cst = arith.constant dense<0.000000e+00> : vector<16x128xf32>
    %3 = tpu.matmul %1, %2, %cst {dimension_numbers = #tpu.dot_dimension_numbers<[1], [0], [0], [1], [0, 0, 1, 1], [], []>} : vector<16x32xbf16>, vector<32x128xbf16>, vector<16x128xf32> -> vector<16x128xf32>
    %c0_3 = arith.constant 0 : index
    %c0_4 = arith.constant 0 : index
    %4 = vector.load %arg3[%c0_3, %c0_4] : memref<1x128xf32, #tpu.memory_space<vmem>>, vector<1x128xf32>
    %5 = vector.broadcast %4 : vector<1x128xf32> to vector<16x128xf32>
    %6 = arith.addf %3, %5 : vector<16x128xf32>
    %7 = vector.extract_strided_slice %6 {offsets = [0, 0], sizes = [16, 32], strides = [1, 1]} : vector<16x128xf32> to vector<16x32xf32>
    %8 = vector.extract_strided_slice %6 {offsets = [0, 32], sizes = [16, 32], strides = [1, 1]} : vector<16x128xf32> to vector<16x32xf32>
    %9 = vector.extract_strided_slice %6 {offsets = [0, 64], sizes = [16, 32], strides = [1, 1]} : vector<16x128xf32> to vector<16x32xf32>
    %c0_5 = arith.constant 0 : index
    %c0_6 = arith.constant 0 : index
    %10 = vector.load %arg4[%c0_5, %c0_6] : memref<32x128xbf16, #tpu.memory_space<vmem>>, vector<32x128xbf16>
    %11 = vector.extract_strided_slice %7 {offsets = [0, 0], sizes = [8, 8], strides = [1, 1]} : vector<16x32xf32> to vector<8x8xf32>
    %12 = arith.truncf %11 : vector<8x8xf32> to vector<8x8xbf16>
    %13 = vector.extract_strided_slice %8 {offsets = [0, 0], sizes = [8, 8], strides = [1, 1]} : vector<16x32xf32> to vector<8x8xf32>
    %14 = arith.truncf %13 : vector<8x8xf32> to vector<8x8xbf16>
    %15 = vector.extract_strided_slice %9 {offsets = [0, 0], sizes = [8, 8], strides = [1, 1]} : vector<16x32xf32> to vector<8x8xf32>
    %16 = arith.truncf %15 : vector<8x8xf32> to vector<8x8xbf16>
    %cst_7 = arith.constant dense<0.000000e+00> : vector<8x8xf32>
    %17 = tpu.matmul %12, %14, %cst_7 {dimension_numbers = #tpu.dot_dimension_numbers<[1], [1], [0], [0], [0, 0, 1, 0], [], []>} : vector<8x8xbf16>, vector<8x8xbf16>, vector<8x8xf32> -> vector<8x8xf32>
    %cst_8 = arith.constant dense<0xFF800000> : vector<8xf32>
    %18 = vector.multi_reduction <maximumf>, %17, %cst_8 [1] : vector<8x8xf32> to vector<8xf32>
    %19 = vector.shape_cast %18 : vector<8xf32> to vector<8x1xf32>
    %20 = vector.broadcast %19 : vector<8x1xf32> to vector<8x8xf32>
    %21 = arith.subf %17, %20 : vector<8x8xf32>
    %22 = math.exp %21 : vector<8x8xf32>
    %cst_9 = arith.constant dense<0.000000e+00> : vector<8xf32>
    %23 = vector.multi_reduction <add>, %22, %cst_9 [1] : vector<8x8xf32> to vector<8xf32>
    %24 = vector.shape_cast %23 : vector<8xf32> to vector<8x1xf32>
    %25 = tpu.reciprocal %24 : vector<8x1xf32> -> vector<8x1xf32>
    %26 = vector.broadcast %25 : vector<8x1xf32> to vector<8x8xf32>
    %27 = arith.mulf %22, %26 : vector<8x8xf32>
    %28 = arith.truncf %27 : vector<8x8xf32> to vector<8x8xbf16>
    %cst_10 = arith.constant dense<0.000000e+00> : vector<8x8xf32>
    %29 = tpu.matmul %28, %16, %cst_10 {dimension_numbers = #tpu.dot_dimension_numbers<[1], [0], [0], [1], [0, 0, 1, 1], [], []>} : vector<8x8xbf16>, vector<8x8xbf16>, vector<8x8xf32> -> vector<8x8xf32>
    %30 = vector.extract_strided_slice %7 {offsets = [0, 8], sizes = [8, 8], strides = [1, 1]} : vector<16x32xf32> to vector<8x8xf32>
    %31 = arith.truncf %30 : vector<8x8xf32> to vector<8x8xbf16>
    %32 = vector.extract_strided_slice %8 {offsets = [0, 8], sizes = [8, 8], strides = [1, 1]} : vector<16x32xf32> to vector<8x8xf32>
    %33 = arith.truncf %32 : vector<8x8xf32> to vector<8x8xbf16>
    %34 = vector.extract_strided_slice %9 {offsets = [0, 8], sizes = [8, 8], strides = [1, 1]} : vector<16x32xf32> to vector<8x8xf32>
    %35 = arith.truncf %34 : vector<8x8xf32> to vector<8x8xbf16>
    %cst_11 = arith.constant dense<0.000000e+00> : vector<8x8xf32>
    %36 = tpu.matmul %31, %33, %cst_11 {dimension_numbers = #tpu.dot_dimension_numbers<[1], [1], [0], [0], [0, 0, 1, 0], [], []>} : vector<8x8xbf16>, vector<8x8xbf16>, vector<8x8xf32> -> vector<8x8xf32>
    %cst_12 = arith.constant dense<0xFF800000> : vector<8xf32>
    %37 = vector.multi_reduction <maximumf>, %36, %cst_12 [1] : vector<8x8xf32> to vector<8xf32>
    %38 = vector.shape_cast %37 : vector<8xf32> to vector<8x1xf32>
    %39 = vector.broadcast %38 : vector<8x1xf32> to vector<8x8xf32>
    %40 = arith.subf %36, %39 : vector<8x8xf32>
    %41 = math.exp %40 : vector<8x8xf32>
    %cst_13 = arith.constant dense<0.000000e+00> : vector<8xf32>
    %42 = vector.multi_reduction <add>, %41, %cst_13 [1] : vector<8x8xf32> to vector<8xf32>
    %43 = vector.shape_cast %42 : vector<8xf32> to vector<8x1xf32>
    %44 = tpu.reciprocal %43 : vector<8x1xf32> -> vector<8x1xf32>
    %45 = vector.broadcast %44 : vector<8x1xf32> to vector<8x8xf32>
    %46 = arith.mulf %41, %45 : vector<8x8xf32>
    %47 = arith.truncf %46 : vector<8x8xf32> to vector<8x8xbf16>
    %cst_14 = arith.constant dense<0.000000e+00> : vector<8x8xf32>
    %48 = tpu.matmul %47, %35, %cst_14 {dimension_numbers = #tpu.dot_dimension_numbers<[1], [0], [0], [1], [0, 0, 1, 1], [], []>} : vector<8x8xbf16>, vector<8x8xbf16>, vector<8x8xf32> -> vector<8x8xf32>
    %49 = vector.extract_strided_slice %7 {offsets = [0, 16], sizes = [8, 8], strides = [1, 1]} : vector<16x32xf32> to vector<8x8xf32>
    %50 = arith.truncf %49 : vector<8x8xf32> to vector<8x8xbf16>
    %51 = vector.extract_strided_slice %8 {offsets = [0, 16], sizes = [8, 8], strides = [1, 1]} : vector<16x32xf32> to vector<8x8xf32>
    %52 = arith.truncf %51 : vector<8x8xf32> to vector<8x8xbf16>
    %53 = vector.extract_strided_slice %9 {offsets = [0, 16], sizes = [8, 8], strides = [1, 1]} : vector<16x32xf32> to vector<8x8xf32>
    %54 = arith.truncf %53 : vector<8x8xf32> to vector<8x8xbf16>
    %cst_15 = arith.constant dense<0.000000e+00> : vector<8x8xf32>
    %55 = tpu.matmul %50, %52, %cst_15 {dimension_numbers = #tpu.dot_dimension_numbers<[1], [1], [0], [0], [0, 0, 1, 0], [], []>} : vector<8x8xbf16>, vector<8x8xbf16>, vector<8x8xf32> -> vector<8x8xf32>
    %cst_16 = arith.constant dense<0xFF800000> : vector<8xf32>
    %56 = vector.multi_reduction <maximumf>, %55, %cst_16 [1] : vector<8x8xf32> to vector<8xf32>
    %57 = vector.shape_cast %56 : vector<8xf32> to vector<8x1xf32>
    %58 = vector.broadcast %57 : vector<8x1xf32> to vector<8x8xf32>
    %59 = arith.subf %55, %58 : vector<8x8xf32>
    %60 = math.exp %59 : vector<8x8xf32>
    %cst_17 = arith.constant dense<0.000000e+00> : vector<8xf32>
    %61 = vector.multi_reduction <add>, %60, %cst_17 [1] : vector<8x8xf32> to vector<8xf32>
    %62 = vector.shape_cast %61 : vector<8xf32> to vector<8x1xf32>
    %63 = tpu.reciprocal %62 : vector<8x1xf32> -> vector<8x1xf32>
    %64 = vector.broadcast %63 : vector<8x1xf32> to vector<8x8xf32>
    %65 = arith.mulf %60, %64 : vector<8x8xf32>
    %66 = arith.truncf %65 : vector<8x8xf32> to vector<8x8xbf16>
    %cst_18 = arith.constant dense<0.000000e+00> : vector<8x8xf32>
    %67 = tpu.matmul %66, %54, %cst_18 {dimension_numbers = #tpu.dot_dimension_numbers<[1], [0], [0], [1], [0, 0, 1, 1], [], []>} : vector<8x8xbf16>, vector<8x8xbf16>, vector<8x8xf32> -> vector<8x8xf32>
    %68 = vector.extract_strided_slice %7 {offsets = [0, 24], sizes = [8, 8], strides = [1, 1]} : vector<16x32xf32> to vector<8x8xf32>
    %69 = arith.truncf %68 : vector<8x8xf32> to vector<8x8xbf16>
    %70 = vector.extract_strided_slice %8 {offsets = [0, 24], sizes = [8, 8], strides = [1, 1]} : vector<16x32xf32> to vector<8x8xf32>
    %71 = arith.truncf %70 : vector<8x8xf32> to vector<8x8xbf16>
    %72 = vector.extract_strided_slice %9 {offsets = [0, 24], sizes = [8, 8], strides = [1, 1]} : vector<16x32xf32> to vector<8x8xf32>
    %73 = arith.truncf %72 : vector<8x8xf32> to vector<8x8xbf16>
    %cst_19 = arith.constant dense<0.000000e+00> : vector<8x8xf32>
    %74 = tpu.matmul %69, %71, %cst_19 {dimension_numbers = #tpu.dot_dimension_numbers<[1], [1], [0], [0], [0, 0, 1, 0], [], []>} : vector<8x8xbf16>, vector<8x8xbf16>, vector<8x8xf32> -> vector<8x8xf32>
    %cst_20 = arith.constant dense<0xFF800000> : vector<8xf32>
    %75 = vector.multi_reduction <maximumf>, %74, %cst_20 [1] : vector<8x8xf32> to vector<8xf32>
    %76 = vector.shape_cast %75 : vector<8xf32> to vector<8x1xf32>
    %77 = vector.broadcast %76 : vector<8x1xf32> to vector<8x8xf32>
    %78 = arith.subf %74, %77 : vector<8x8xf32>
    %79 = math.exp %78 : vector<8x8xf32>
    %cst_21 = arith.constant dense<0.000000e+00> : vector<8xf32>
    %80 = vector.multi_reduction <add>, %79, %cst_21 [1] : vector<8x8xf32> to vector<8xf32>
    %81 = vector.shape_cast %80 : vector<8xf32> to vector<8x1xf32>
    %82 = tpu.reciprocal %81 : vector<8x1xf32> -> vector<8x1xf32>
    %83 = vector.broadcast %82 : vector<8x1xf32> to vector<8x8xf32>
    %84 = arith.mulf %79, %83 : vector<8x8xf32>
    %85 = arith.truncf %84 : vector<8x8xf32> to vector<8x8xbf16>
    %cst_22 = arith.constant dense<0.000000e+00> : vector<8x8xf32>
    %86 = tpu.matmul %85, %73, %cst_22 {dimension_numbers = #tpu.dot_dimension_numbers<[1], [0], [0], [1], [0, 0, 1, 1], [], []>} : vector<8x8xbf16>, vector<8x8xbf16>, vector<8x8xf32> -> vector<8x8xf32>
    %87 = tpu.concatenate %29, %48, %67, %86 in 1 : vector<8x8xf32>, vector<8x8xf32>, vector<8x8xf32>, vector<8x8xf32> -> vector<8x32xf32>
    %88 = arith.truncf %87 : vector<8x32xf32> to vector<8x32xbf16>
    %cst_23 = arith.constant dense<0.000000e+00> : vector<8x128xf32>
    %89 = tpu.matmul %88, %10, %cst_23 {dimension_numbers = #tpu.dot_dimension_numbers<[1], [0], [0], [1], [0, 0, 1, 1], [], []>} : vector<8x32xbf16>, vector<32x128xbf16>, vector<8x128xf32> -> vector<8x128xf32>
    %c0_24 = arith.constant 0 : index
    %c0_25 = arith.constant 0 : index
    %90 = vector.load %arg5[%c0_24, %c0_25] : memref<1x128xf32, #tpu.memory_space<vmem>>, vector<1x128xf32>
    %91 = vector.broadcast %90 : vector<1x128xf32> to vector<8x128xf32>
    %92 = arith.addf %89, %91 : vector<8x128xf32>
    %c0_26 = arith.constant 0 : index
    %c0_27 = arith.constant 0 : index
    %93 = vector.load %arg6[%c0_26, %c0_27] : memref<16x128xf32, #tpu.memory_space<vmem>>, vector<8x128xf32>
    tpu.vector_store %arg6[%c0_26, %c0_27], %92 {strides = array<i32>} : memref<16x128xf32, #tpu.memory_space<vmem>>, vector<8x128xf32>,
    %94 = vector.extract_strided_slice %7 {offsets = [8, 0], sizes = [8, 8], strides = [1, 1]} : vector<16x32xf32> to vector<8x8xf32>
    %95 = arith.truncf %94 : vector<8x8xf32> to vector<8x8xbf16>
    %96 = vector.extract_strided_slice %8 {offsets = [8, 0], sizes = [8, 8], strides = [1, 1]} : vector<16x32xf32> to vector<8x8xf32>
    %97 = arith.truncf %96 : vector<8x8xf32> to vector<8x8xbf16>
    %98 = vector.extract_strided_slice %9 {offsets = [8, 0], sizes = [8, 8], strides = [1, 1]} : vector<16x32xf32> to vector<8x8xf32>
    %99 = arith.truncf %98 : vector<8x8xf32> to vector<8x8xbf16>
    %cst_28 = arith.constant dense<0.000000e+00> : vector<8x8xf32>
    %100 = tpu.matmul %95, %97, %cst_28 {dimension_numbers = #tpu.dot_dimension_numbers<[1], [1], [0], [0], [0, 0, 1, 0], [], []>} : vector<8x8xbf16>, vector<8x8xbf16>, vector<8x8xf32> -> vector<8x8xf32>
    %cst_29 = arith.constant dense<0xFF800000> : vector<8xf32>
    %101 = vector.multi_reduction <maximumf>, %100, %cst_29 [1] : vector<8x8xf32> to vector<8xf32>
    %102 = vector.shape_cast %101 : vector<8xf32> to vector<8x1xf32>
    %103 = vector.broadcast %102 : vector<8x1xf32> to vector<8x8xf32>
    %104 = arith.subf %100, %103 : vector<8x8xf32>
    %105 = math.exp %104 : vector<8x8xf32>
    %cst_30 = arith.constant dense<0.000000e+00> : vector<8xf32>
    %106 = vector.multi_reduction <add>, %105, %cst_30 [1] : vector<8x8xf32> to vector<8xf32>
    %107 = vector.shape_cast %106 : vector<8xf32> to vector<8x1xf32>
    %108 = tpu.reciprocal %107 : vector<8x1xf32> -> vector<8x1xf32>
    %109 = vector.broadcast %108 : vector<8x1xf32> to vector<8x8xf32>
    %110 = arith.mulf %105, %109 : vector<8x8xf32>
    %111 = arith.truncf %110 : vector<8x8xf32> to vector<8x8xbf16>
    %cst_31 = arith.constant dense<0.000000e+00> : vector<8x8xf32>
    %112 = tpu.matmul %111, %99, %cst_31 {dimension_numbers = #tpu.dot_dimension_numbers<[1], [0], [0], [1], [0, 0, 1, 1], [], []>} : vector<8x8xbf16>, vector<8x8xbf16>, vector<8x8xf32> -> vector<8x8xf32>
    %113 = vector.extract_strided_slice %7 {offsets = [8, 8], sizes = [8, 8], strides = [1, 1]} : vector<16x32xf32> to vector<8x8xf32>
    %114 = arith.truncf %113 : vector<8x8xf32> to vector<8x8xbf16>
    %115 = vector.extract_strided_slice %8 {offsets = [8, 8], sizes = [8, 8], strides = [1, 1]} : vector<16x32xf32> to vector<8x8xf32>
    %116 = arith.truncf %115 : vector<8x8xf32> to vector<8x8xbf16>
    %117 = vector.extract_strided_slice %9 {offsets = [8, 8], sizes = [8, 8], strides = [1, 1]} : vector<16x32xf32> to vector<8x8xf32>
    %118 = arith.truncf %117 : vector<8x8xf32> to vector<8x8xbf16>
    %cst_32 = arith.constant dense<0.000000e+00> : vector<8x8xf32>
    %119 = tpu.matmul %114, %116, %cst_32 {dimension_numbers = #tpu.dot_dimension_numbers<[1], [1], [0], [0], [0, 0, 1, 0], [], []>} : vector<8x8xbf16>, vector<8x8xbf16>, vector<8x8xf32> -> vector<8x8xf32>
    %cst_33 = arith.constant dense<0xFF800000> : vector<8xf32>
    %120 = vector.multi_reduction <maximumf>, %119, %cst_33 [1] : vector<8x8xf32> to vector<8xf32>
    %121 = vector.shape_cast %120 : vector<8xf32> to vector<8x1xf32>
    %122 = vector.broadcast %121 : vector<8x1xf32> to vector<8x8xf32>
    %123 = arith.subf %119, %122 : vector<8x8xf32>
    %124 = math.exp %123 : vector<8x8xf32>
    %cst_34 = arith.constant dense<0.000000e+00> : vector<8xf32>
    %125 = vector.multi_reduction <add>, %124, %cst_34 [1] : vector<8x8xf32> to vector<8xf32>
    %126 = vector.shape_cast %125 : vector<8xf32> to vector<8x1xf32>
    %127 = tpu.reciprocal %126 : vector<8x1xf32> -> vector<8x1xf32>
    %128 = vector.broadcast %127 : vector<8x1xf32> to vector<8x8xf32>
    %129 = arith.mulf %124, %128 : vector<8x8xf32>
    %130 = arith.truncf %129 : vector<8x8xf32> to vector<8x8xbf16>
    %cst_35 = arith.constant dense<0.000000e+00> : vector<8x8xf32>
    %131 = tpu.matmul %130, %118, %cst_35 {dimension_numbers = #tpu.dot_dimension_numbers<[1], [0], [0], [1], [0, 0, 1, 1], [], []>} : vector<8x8xbf16>, vector<8x8xbf16>, vector<8x8xf32> -> vector<8x8xf32>
    %132 = vector.extract_strided_slice %7 {offsets = [8, 16], sizes = [8, 8], strides = [1, 1]} : vector<16x32xf32> to vector<8x8xf32>
    %133 = arith.truncf %132 : vector<8x8xf32> to vector<8x8xbf16>
    %134 = vector.extract_strided_slice %8 {offsets = [8, 16], sizes = [8, 8], strides = [1, 1]} : vector<16x32xf32> to vector<8x8xf32>
    %135 = arith.truncf %134 : vector<8x8xf32> to vector<8x8xbf16>
    %136 = vector.extract_strided_slice %9 {offsets = [8, 16], sizes = [8, 8], strides = [1, 1]} : vector<16x32xf32> to vector<8x8xf32>
    %137 = arith.truncf %136 : vector<8x8xf32> to vector<8x8xbf16>
    %cst_36 = arith.constant dense<0.000000e+00> : vector<8x8xf32>
    %138 = tpu.matmul %133, %135, %cst_36 {dimension_numbers = #tpu.dot_dimension_numbers<[1], [1], [0], [0], [0, 0, 1, 0], [], []>} : vector<8x8xbf16>, vector<8x8xbf16>, vector<8x8xf32> -> vector<8x8xf32>
    %cst_37 = arith.constant dense<0xFF800000> : vector<8xf32>
    %139 = vector.multi_reduction <maximumf>, %138, %cst_37 [1] : vector<8x8xf32> to vector<8xf32>
    %140 = vector.shape_cast %139 : vector<8xf32> to vector<8x1xf32>
    %141 = vector.broadcast %140 : vector<8x1xf32> to vector<8x8xf32>
    %142 = arith.subf %138, %141 : vector<8x8xf32>
    %143 = math.exp %142 : vector<8x8xf32>
    %cst_38 = arith.constant dense<0.000000e+00> : vector<8xf32>
    %144 = vector.multi_reduction <add>, %143, %cst_38 [1] : vector<8x8xf32> to vector<8xf32>
    %145 = vector.shape_cast %144 : vector<8xf32> to vector<8x1xf32>
    %146 = tpu.reciprocal %145 : vector<8x1xf32> -> vector<8x1xf32>
    %147 = vector.broadcast %146 : vector<8x1xf32> to vector<8x8xf32>
    %148 = arith.mulf %143, %147 : vector<8x8xf32>
    %149 = arith.truncf %148 : vector<8x8xf32> to vector<8x8xbf16>
    %cst_39 = arith.constant dense<0.000000e+00> : vector<8x8xf32>
    %150 = tpu.matmul %149, %137, %cst_39 {dimension_numbers = #tpu.dot_dimension_numbers<[1], [0], [0], [1], [0, 0, 1, 1], [], []>} : vector<8x8xbf16>, vector<8x8xbf16>, vector<8x8xf32> -> vector<8x8xf32>
    %151 = vector.extract_strided_slice %7 {offsets = [8, 24], sizes = [8, 8], strides = [1, 1]} : vector<16x32xf32> to vector<8x8xf32>
    %152 = arith.truncf %151 : vector<8x8xf32> to vector<8x8xbf16>
    %153 = vector.extract_strided_slice %8 {offsets = [8, 24], sizes = [8, 8], strides = [1, 1]} : vector<16x32xf32> to vector<8x8xf32>
    %154 = arith.truncf %153 : vector<8x8xf32> to vector<8x8xbf16>
    %155 = vector.extract_strided_slice %9 {offsets = [8, 24], sizes = [8, 8], strides = [1, 1]} : vector<16x32xf32> to vector<8x8xf32>
    %156 = arith.truncf %155 : vector<8x8xf32> to vector<8x8xbf16>
    %cst_40 = arith.constant dense<0.000000e+00> : vector<8x8xf32>
    %157 = tpu.matmul %152, %154, %cst_40 {dimension_numbers = #tpu.dot_dimension_numbers<[1], [1], [0], [0], [0, 0, 1, 0], [], []>} : vector<8x8xbf16>, vector<8x8xbf16>, vector<8x8xf32> -> vector<8x8xf32>
    %cst_41 = arith.constant dense<0xFF800000> : vector<8xf32>
    %158 = vector.multi_reduction <maximumf>, %157, %cst_41 [1] : vector<8x8xf32> to vector<8xf32>
    %159 = vector.shape_cast %158 : vector<8xf32> to vector<8x1xf32>
    %160 = vector.broadcast %159 : vector<8x1xf32> to vector<8x8xf32>
    %161 = arith.subf %157, %160 : vector<8x8xf32>
    %162 = math.exp %161 : vector<8x8xf32>
    %cst_42 = arith.constant dense<0.000000e+00> : vector<8xf32>
    %163 = vector.multi_reduction <add>, %162, %cst_42 [1] : vector<8x8xf32> to vector<8xf32>
    %164 = vector.shape_cast %163 : vector<8xf32> to vector<8x1xf32>
    %165 = tpu.reciprocal %164 : vector<8x1xf32> -> vector<8x1xf32>
    %166 = vector.broadcast %165 : vector<8x1xf32> to vector<8x8xf32>
    %167 = arith.mulf %162, %166 : vector<8x8xf32>
    %168 = arith.truncf %167 : vector<8x8xf32> to vector<8x8xbf16>
    %cst_43 = arith.constant dense<0.000000e+00> : vector<8x8xf32>
    %169 = tpu.matmul %168, %156, %cst_43 {dimension_numbers = #tpu.dot_dimension_numbers<[1], [0], [0], [1], [0, 0, 1, 1], [], []>} : vector<8x8xbf16>, vector<8x8xbf16>, vector<8x8xf32> -> vector<8x8xf32>
    %170 = tpu.concatenate %112, %131, %150, %169 in 1 : vector<8x8xf32>, vector<8x8xf32>, vector<8x8xf32>, vector<8x8xf32> -> vector<8x32xf32>
    %171 = arith.truncf %170 : vector<8x32xf32> to vector<8x32xbf16>
    %cst_44 = arith.constant dense<0.000000e+00> : vector<8x128xf32>
    %172 = tpu.matmul %171, %10, %cst_44 {dimension_numbers = #tpu.dot_dimension_numbers<[1], [0], [0], [1], [0, 0, 1, 1], [], []>} : vector<8x32xbf16>, vector<32x128xbf16>, vector<8x128xf32> -> vector<8x128xf32>
    %c0_45 = arith.constant 0 : index
    %c0_46 = arith.constant 0 : index
    %173 = vector.load %arg5[%c0_45, %c0_46] : memref<1x128xf32, #tpu.memory_space<vmem>>, vector<1x128xf32>
    %174 = vector.broadcast %173 : vector<1x128xf32> to vector<8x128xf32>
    %175 = arith.addf %172, %174 : vector<8x128xf32>
    %c8 = arith.constant 8 : index
    %c0_47 = arith.constant 0 : index
    %176 = vector.load %arg6[%c8, %c0_47] : memref<16x128xf32, #tpu.memory_space<vmem>>, vector<8x128xf32>
    tpu.vector_store %arg6[%c8, %c0_47], %175 {strides = array<i32>} : memref<16x128xf32, #tpu.memory_space<vmem>>, vector<8x128xf32>,
    return
  }
  func.func @transform_0(%arg0: i32) -> (i32, i32) {
    %c0_i32 = arith.constant 0 : i32
    %c0_i32_0 = arith.constant 0 : i32
    %c0_i32_1 = arith.constant 0 : i32
    return %c0_i32, %c0_i32_0 : i32, i32
  }
  func.func @transform_1(%arg0: i32) -> (i32, i32) {
    %c0_i32 = arith.constant 0 : i32
    %c0_i32_0 = arith.constant 0 : i32
    %c0_i32_1 = arith.constant 0 : i32
    return %c0_i32, %c0_i32_0 : i32, i32
  }
  func.func @transform_2(%arg0: i32) -> (i32, i32) {
    %c0_i32 = arith.constant 0 : i32
    %c0_i32_0 = arith.constant 0 : i32
    %c0_i32_1 = arith.constant 0 : i32
    return %c0_i32, %c0_i32_0 : i32, i32
  }
  func.func @transform_3(%arg0: i32) -> (i32, i32) {
    %c0_i32 = arith.constant 0 : i32
    %c0_i32_0 = arith.constant 0 : i32
    %c0_i32_1 = arith.constant 0 : i32
    return %c0_i32, %c0_i32_0 : i32, i32
  }
  func.func @transform_4(%arg0: i32) -> (i32, i32) {
    %c0_i32 = arith.constant 0 : i32
    %c0_i32_0 = arith.constant 0 : i32
    %c0_i32_1 = arith.constant 0 : i32
    return %c0_i32, %c0_i32_0 : i32, i32
  }
  func.func @transform_5(%arg0: i32) -> (i32, i32) {
    %c0_i32 = arith.constant 0 : i32
    %c0_i32_0 = arith.constant 0 : i32
    %c0_i32_1 = arith.constant 0 : i32
    return %c0_i32, %c0_i32_0 : i32, i32
  }
}

</mosaic_0001>

<bundles_post_ra>
// kernel: multi_head_self_attention.1
= control target key start
LH: loop header
LB: loop body
LE: loop exit
PB: predicated region body
PF: predicated region fallthrough
CT: control target
= control target key end

     0   :  { %10 = vsyncpa [#allocation3], 0  ;;  %s1745_s0 = inlined_call_operand.hbm [shape: f32[16,32], index: 0, kind: input, shape index: {}]   ;;  %s1746_s1 = inlined_call_operand.hbm [shape: bf16[32,128], index: 1, kind: input, shape index: {}]   ;;  %s1747_s2 = inlined_call_operand.vmem [shape: f32[1,128], index: 2, kind: input, shape index: {}]   ;;  %s1748_s3 = inlined_call_operand.hbm [shape: bf16[32,128], index: 3, kind: input, shape index: {}]   ;;  %s1749_s4 = inlined_call_operand.vmem [shape: f32[1,128], index: 4, kind: input, shape index: {}]   ;;  %s1750_s5 = inlined_call_operand.vmem [shape: f32[16,128], index: 5, kind: output, shape index: {}]  }
   0x1   :  { %11 = vsyncpa [#allocation5], 0  ;;  %s1481_s18 = smov [#allocation4]  }
   0x2   :  { %s29_s19 = sshll.u32 %s1481_s18, 4  ;;  %s30_s19 = int_to_ptr.vmem [resolvable:$true] %s29_s19 }
   0x3   :  { %s1425_s20 = scalar_lea.vmem %s30_s19, 256  ;;  %p1430_p1 = scmp.lt.s32.totalorder %s30_s19, %s30_s19 }
   0x4   :  { %p1426_p0 = scmp.ne.s32.totalorder %s30_s19, %s1425_s20  ;;  %p1431_p2 = scmp.lt.s32.totalorder %s1425_s20, %s1425_s20 }
   0x6   :  { %p1432_p3 = por %p1431_p2, %p1430_p1 }
   0x8   :  { %p1433_p4 = pnand %p1432_p3, %p1426_p0 }
   0xa   :  { %1436 = shalt.err (!%p1433_p4)
}
   0xb   :  { %s1482_s21 = smov 64   ;;  %s1483_s22 = smov 4  }
   0xc   :  { %35 = dma.hbm_to_vmem [thread:$0]  %s1746_s1, 256, %s30_s19, [#allocation5], %s1482_s21, %s1482_s21, %s1483_s22  }
   0xd   :  { %s1484_s25 = smov [#allocation2]  }
   0xe   :  { %s17_s26 = sshll.u32 %s1484_s25, 4  ;;  %s18_s26 = int_to_ptr.vmem [resolvable:$true] %s17_s26 }
   0xf   :  { %s1445_s27 = scalar_lea.vmem %s18_s26, 256  ;;  %p1450_p6 = scmp.lt.s32.totalorder %s18_s26, %s18_s26 }
  0x10   :  { %p1446_p5 = scmp.ne.s32.totalorder %s18_s26, %s1445_s27  ;;  %p1451_p7 = scmp.lt.s32.totalorder %s1445_s27, %s1445_s27 }
  0x12   :  { %p1452_p8 = por %p1451_p7, %p1450_p6 }
  0x14   :  { %p1453_p9 = pnand %p1452_p8, %p1446_p5 }
  0x16   :  { %1456 = shalt.err (!%p1453_p9)
}
  0x17   :  { %s1485_s28 = smov 128   ;;  %s1486_s29 = smov 8  }
  0x18   :  { %23 = dma.hbm_to_vmem [thread:$0]  %s1745_s0, 256, %s18_s26, [#allocation3], %s1485_s28, %s1485_s28, %s1486_s29  }
  0x19   :  { %s1487_s7 = smov [#allocation6]  }
  0x1a   :  { %s43_s8 = sshll.u32 %s1487_s7, 4  ;;  %s44_s8 = int_to_ptr.vmem [resolvable:$true] %s43_s8 }
  0x1b   :  { %s1465_s1 = scalar_lea.vmem %s44_s8, 256  ;;  %p1470_p11 = scmp.lt.s32.totalorder %s44_s8, %s44_s8 }
  0x1c   :  { %p1466_p10 = scmp.ne.s32.totalorder %s44_s8, %s1465_s1  ;;  %p1471_p12 = scmp.lt.s32.totalorder %s1465_s1, %s1465_s1 }
  0x1e   :  { %p1472_p13 = por %p1471_p12, %p1470_p11 }
  0x20   :  { %p1473_p0 = pnand %p1472_p13, %p1466_p10 }
  0x22   :  { %1476 = shalt.err (!%p1473_p0)
}
  0x23   :  { %49 = dma.hbm_to_vmem [thread:$0]  %s1748_s3, 256, %s44_s8, [#allocation5], %s1482_s21, %s1482_s21, %s1483_s22  }
  0x24   :  { %1477 = dma.done.wait [#allocation3], 256  }
  0x25   :  { %1478 = vsyncadd [#allocation3], 4294967040 }
  0x26   :  { %1479 = dma.done.wait [#allocation5], 512  }
  0x27   :  { %1480 = vsyncadd [#allocation5], 4294966784  ;;  %v1488_v0 = vmov 0.0   ;;  %vm1489_vm0 = vmmov 0   ;;  %v1381_v1 = vld [vmem:[#allocation4 + $0x8] sm:$0xff]   ;;  %v1382_v2 = vld [vmem:[#allocation4] sm:$0xff]  }
  0x28   :  { %1240 = vmatprep.subr.bf16.mxu0 %v1488_v0  ;;  %1244 = vmatprep.mubr.msk.bf16.mxu0 %vm1489_vm0, %v1488_v0  ;;  %v62_v3 = vld [vmem:[#allocation2] sm:$0xff]  ;;  %v63_v4 = vld [vmem:[#allocation2 + $0x8] sm:$0xff]  ;;  %vm88_vm1 = vcmask 261120   ;;  %s1490_s11 = smov 120   ;;  %s1491_s12 = smov 96   ;;  %vm141_vm2 = vcmask 64512  }
  0x29   :  { %1248 = vmatprep.subr.bf16.mxu1 %v1488_v0  ;;  %1250 = vmatprep.mubr.msk.bf16.mxu1 %vm1489_vm0, %v1488_v0  ;;  %v64_v5 = vpack.c.bf16 %v63_v4, %v62_v3  ;;  %v1173_v6 = vld [vmem:[%s1747_s2] ss:$0 sm:$0xff]  ;;  %s1492_s13 = smov 80   ;;  %s1493_s2 = smov 88   ;;  %vm205_vm3 = vcmask 1043456   ;;  %vm592_vm4 = vcmask 130048  }
  0x2a   :  { %1241 = vmatpush3.bf16.msra.mxu0 %v1381_v1  ;;  %s1494_s14 = smov 72   ;;  %s1495_s15 = smov 112   ;;  %vm594_vm5 = vcmask 195584  }
  0x2b   :  { %1242 = vmatprep.subr.bf16.mxu0 %v1488_v0  ;;  %s1496_s16 = smov 104   ;;  %s1497_s17 = smov 56  }
  0x2c   :  { %s1498_s18 = smov 48   ;;  %s1499_s19 = smov 40  }
  0x2d   :  { %s1500_s20 = smov 16   ;;  %s1501_s22 = smov 24  }
  0x2e   :  { %1243 = vmatpush3.bf16.msra.mxu0 %v1382_v2 }
  0x2f   :  { %1254 = vmatprep.subr.bf16.mxu0 %v1488_v0 }
  0x31   :  { %1245 = vmatmul.mubr.msk.bf16.vlgmr.msra.gmra.mxu0 %vm88_vm1, %v64_v5 }
  0x32   :  { %1256 = vmatprep.mubr.msk.bf16.mxu0 %vm1489_vm0, %v1488_v0 }
  0xf1   :  { %v126_v7 = vpop.f32.mrf.mxu0 }
  0xf2   :  { %v127_v8 = vadd.f32 %v1173_v6, %v126_v7 }
  0xf3   :  { %v1246_v9 = vpop.f32.mrf.mxu0 }
  0xf4   :  { %v1560_v10 = vpack.c.bf16 %v127_v8, %v127_v8 }
  0xf5   :  { %v129_v11 = vpop.f32.mrf.mxu0 }
  0xf6   :  { %v1562_v12 = vadd.f32 %v1173_v6, %v129_v11  ;;  %249 = vrot.lane.b32.xlu1 %v1560_v10, %s1490_s11  ;;  %139 = vrot.lane.b32.xlu0 %v1560_v10, %s1491_s12 }
  0xf7   :  { %v1247_v13 = vpop.f32.mrf.mxu0 }
  0xf8   :  { %v1616_v62 = vpack.c.bf16 %v1562_v12, %v1562_v12 }
  0xfa   :  { %361 = vrot.lane.b32.xlu1 %v1560_v10, %s1492_s13  ;;  %251 = vrot.lane.b32.xlu0 %v1560_v10, %s1493_s2 }
  0xfe   :  { %471 = vrot.lane.b32.xlu1 %v1560_v10, %s1494_s14  ;;  %359 = vrot.lane.b32.xlu0 %v1560_v10, %s1495_s15 }
 0x102   :  { %469 = vrot.lane.b32.xlu0 %v1560_v10, %s1496_s16 }
 0x168   :  { %v140_v14 = vpop.permute.xlu0 %139  ;;  %v250_v17 = vpop.permute.xlu1 %249 }
 0x169   :  { %v146_v15 = vsel %vm141_vm2, %v140_v14, 0 }
 0x16a   :  { %1249 = vmatpush3.bf16.xpose.msra.mxu1 %v146_v15 }
 0x16b   :  { %1260 = vmatprep.subr.bf16.mxu1 %v1488_v0 }
 0x16c   :  { %v252_v16 = vpop.permute.xlu0 %251  ;;  %v362_v19 = vpop.permute.xlu1 %361 }
 0x16d   :  { %v257_v18 = vsel %vm141_vm2, %v252_v16, 0  ;;  %v367_v20 = vsel %vm141_vm2, %v362_v19, 0 }
 0x170   :  { %v472_v21 = vpop.permute.xlu1 %471  ;;  %v360_v22 = vpop.permute.xlu0 %359 }
 0x171   :  { %1251 = vmatmul.mubr.msk.bf16.vlgmr.msra.gmra.mxu1 %vm141_vm2, %v1560_v10  ;;  %v477_v23 = vsel %vm141_vm2, %v472_v21, 0 }
 0x172   :  { %1261 = vmatpush3.bf16.xpose.msra.mxu1 %v257_v18  ;;  %1262 = vmatprep.mubr.msk.bf16.mxu1 %vm1489_vm0, %v1488_v0 }
 0x173   :  { %1272 = vmatprep.subr.bf16.mxu1 %v1488_v0 }
 0x174   :  { %v470_v24 = vpop.permute.xlu0 %469 }
 0x179   :  { %1263 = vmatmul.mubr.msk.bf16.vlgmr.msra.gmra.mxu1 %vm141_vm2, %v250_v17 }
 0x17a   :  { %1273 = vmatpush3.bf16.xpose.msra.mxu1 %v367_v20  ;;  %1274 = vmatprep.mubr.msk.bf16.mxu1 %vm1489_vm0, %v1488_v0 }
 0x17b   :  { %1284 = vmatprep.subr.bf16.mxu1 %v1488_v0 }
 0x181   :  { %1275 = vmatmul.mubr.msk.bf16.vlgmr.msra.gmra.mxu1 %vm141_vm2, %v360_v22 }
 0x182   :  { %1285 = vmatpush3.bf16.xpose.msra.mxu1 %v477_v23  ;;  %1286 = vmatprep.mubr.msk.bf16.mxu1 %vm1489_vm0, %v1488_v0 }
 0x183   :  { %1296 = vmatprep.subr.bf16.mxu1 %v1488_v0 }
 0x189   :  { %1287 = vmatmul.mubr.msk.bf16.vlgmr.msra.gmra.mxu1 %vm141_vm2, %v470_v24 }
 0x18a   :  { %1300 = vmatprep.mubr.msk.bf16.mxu1 %vm1489_vm0, %v1488_v0 }
 0x231   :  { %v182_v25 = vpop.f32.mrf.mxu1 }
 0x232   :  { %v188_v26 = vsel %vm141_vm2, %v182_v25, -inf }
 0x233   :  { %189 = vmax.xlane.f32.xlu1 %v188_v26  ;;  %v1252_v27 = vpop.f32.mrf.mxu1 }
 0x235   :  { %v185_v28 = vpop.f32.mrf.mxu1 }
 0x237   :  { %v1253_v29 = vpop.f32.mrf.mxu1 }
 0x239   :  { %v293_v30 = vpop.f32.mrf.mxu1 }
 0x23a   :  { %v299_v31 = vsel %vm141_vm2, %v293_v30, -inf }
 0x23b   :  { %300 = vmax.xlane.f32.xlu0 %v299_v31  ;;  %v1264_v32 = vpop.f32.mrf.mxu1 }
 0x23d   :  { %v296_v33 = vpop.f32.mrf.mxu1 }
 0x23f   :  { %v1265_v34 = vpop.f32.mrf.mxu1 }
 0x241   :  { %v403_v35 = vpop.f32.mrf.mxu1 }
 0x242   :  { %v409_v36 = vsel %vm141_vm2, %v403_v35, -inf }
 0x243   :  { %410 = vmax.xlane.f32.xlu0 %v409_v36  ;;  %v1276_v37 = vpop.f32.mrf.mxu1 }
 0x245   :  { %v406_v38 = vpop.f32.mrf.mxu1 }
 0x247   :  { %v1277_v39 = vpop.f32.mrf.mxu1 }
 0x249   :  { %v513_v40 = vpop.f32.mrf.mxu1 }
 0x24a   :  { %v519_v41 = vsel %vm141_vm2, %v513_v40, -inf }
 0x24b   :  { %520 = vmax.xlane.f32.xlu1 %v519_v41  ;;  %v1288_v42 = vpop.f32.mrf.mxu1 }
 0x24d   :  { %v516_v43 = vpop.f32.mrf.mxu1 }
 0x24f   :  { %v1289_v44 = vpop.f32.mrf.mxu1 }
 0x2bc   :  { %v190_v45 = vpop.xlane.xlu1 %189 }
 0x2bd   :  { %v191_v46 = vsub.f32 %v182_v25, %v190_v45 }
 0x2bf   :  { %v192_v47 = vmul.f32 1.442695, %v191_v46 }
 0x2c1   :  { %1385 = vpow2.f32 %v192_v47 }
 0x2c4   :  { %v301_v48 = vpop.xlane.xlu0 %300 }
 0x2c5   :  { %v302_v49 = vsub.f32 %v293_v30, %v301_v48 }
 0x2c7   :  { %v303_v50 = vmul.f32 1.442695, %v302_v49 }
 0x2c9   :  { %1387 = vpow2.f32 %v303_v50 }
 0x2cc   :  { %v411_v51 = vpop.xlane.xlu0 %410 }
 0x2cd   :  { %v412_v52 = vsub.f32 %v403_v35, %v411_v51 }
 0x2ce   :  { %v1386_v53 = vpop.eup %1385 }
 0x2cf   :  { %v413_v54 = vmul.f32 1.442695, %v412_v52  ;;  %v194_v55 = vsel %vm141_vm2, %v1386_v53, 0.0 }
 0x2d0   :  { %195 = vadd.xlane.f32.xlu0 %v194_v55 }
 0x2d1   :  { %1389 = vpow2.f32 %v413_v54 }
 0x2d4   :  { %v521_v60 = vpop.xlane.xlu1 %520 }
 0x2d5   :  { %v522_v61 = vsub.f32 %v513_v40, %v521_v60 }
 0x2d6   :  { %v1388_v56 = vpop.eup %1387 }
 0x2d7   :  { %v305_v57 = vsel %vm141_vm2, %v1388_v56, 0.0  ;;  %v523_v63 = vmul.f32 1.442695, %v522_v61 }
 0x2d8   :  { %306 = vadd.xlane.f32.xlu1 %v305_v57 }
 0x2d9   :  { %1391 = vpow2.f32 %v523_v63 }
 0x2de   :  { %v1390_v58 = vpop.eup %1389 }
 0x2df   :  { %v415_v59 = vsel %vm141_vm2, %v1390_v58, 0.0 }
 0x2e0   :  { %416 = vadd.xlane.f32.xlu0 %v415_v59 }
 0x2e6   :  { %v1392_v1 = vpop.eup %1391 }
 0x2e7   :  { %v525_v2 = vsel %vm141_vm2, %v1392_v1, 0.0 }
 0x2e9   :  { %311 = vrot.lane.b32.xlu1 %v1560_v10, %s1497_s17 }
 0x2ed   :  { %421 = vrot.lane.b32.xlu1 %v1560_v10, %s1498_s18 }
 0x2f6   :  { %200 = vrot.lane.b32.xlu0 %v1560_v10, %s1482_s21 }
 0x2fa   :  { %531 = vrot.lane.b32.xlu0 %v1560_v10, %s1499_s19 }
 0x2fe   :  { %772 = vrot.lane.b32.xlu0 %v1616_v62, %s1493_s2 }
 0x302   :  { %882 = vrot.lane.b32.xlu0 %v1616_v62, %s1492_s13 }
 0x306   :  { %992 = vrot.lane.b32.xlu0 %v1616_v62, %s1494_s14 }
 0x311   :  { %526 = vadd.xlane.f32.xlu1 %v525_v2 }
 0x322   :  { %662 = vrot.lane.b32.xlu1 %v1616_v62, %s1491_s12 }
 0x326   :  { %770 = vrot.lane.b32.xlu1 %v1616_v62, %s1490_s11 }
 0x32a   :  { %880 = vrot.lane.b32.xlu1 %v1616_v62, %s1495_s15 }
 0x32e   :  { %990 = vrot.lane.b32.xlu1 %v1616_v62, %s1496_s16 }
 0x359   :  { %v196_v3 = vpop.xlane.xlu0 %195 }
 0x35a   :  { %1393 = vrcp.f32 %v196_v3 }
 0x361   :  { %v307_v4 = vpop.xlane.xlu1 %306 }
 0x362   :  { %1395 = vrcp.f32 %v307_v4 }
 0x365   :  { %v312_v10 = vpop.permute.xlu1 %311 }
 0x366   :  { %v317_v13 = vsel %vm205_vm3, %v312_v10, 0 }
 0x367   :  { %v1394_v5 = vpop.eup %1393 }
 0x368   :  { %v198_v7 = vmul.f32 %v1394_v5, %v1386_v53 }
 0x369   :  { %v417_v6 = vpop.xlane.xlu0 %416  ;;  %v422_v15 = vpop.permute.xlu1 %421 }
 0x36a   :  { %1397 = vrcp.f32 %v417_v6  ;;  %v199_v11 = vpack.c.bf16 %v198_v7, %v198_v7  ;;  %v427_v18 = vsel %vm205_vm3, %v422_v15, 0 }
 0x36d   :  { %v201_v8 = vpop.permute.xlu0 %200 }
 0x36e   :  { %v207_v9 = vsel %vm205_vm3, %v201_v8, 0 }
 0x36f   :  { %1255 = vmatpush3.bf16.msra.mxu0 %v207_v9  ;;  %v1396_v12 = vpop.eup %1395 }
 0x370   :  { %1266 = vmatprep.subr.bf16.mxu0 %v1488_v0  ;;  %v309_v14 = vmul.f32 %v1396_v12, %v1388_v56 }
 0x371   :  { %v532_v20 = vpop.permute.xlu0 %531 }
 0x372   :  { %1257 = vmatmul.mubr.msk.bf16.vlgmr.msra.gmra.mxu0 %vm141_vm2, %v199_v11  ;;  %v310_v16 = vpack.c.bf16 %v309_v14, %v309_v14  ;;  %v537_v22 = vsel %vm205_vm3, %v532_v20, 0 }
 0x373   :  { %1267 = vmatpush3.bf16.msra.mxu0 %v317_v13  ;;  %1268 = vmatprep.mubr.msk.bf16.mxu0 %vm1489_vm0, %v1488_v0 }
 0x374   :  { %1278 = vmatprep.subr.bf16.mxu0 %v1488_v0 }
 0x375   :  { %v773_v29 = vpop.permute.xlu0 %772 }
 0x376   :  { %v778_v30 = vsel %vm141_vm2, %v773_v29, 0 }
 0x377   :  { %v1398_v17 = vpop.eup %1397 }
 0x378   :  { %v419_v19 = vmul.f32 %v1398_v17, %v1390_v58 }
 0x379   :  { %v883_v31 = vpop.permute.xlu0 %882 }
 0x37a   :  { %1269 = vmatmul.mubr.msk.bf16.vlgmr.msra.gmra.mxu0 %vm141_vm2, %v310_v16  ;;  %v420_v21 = vpack.c.bf16 %v419_v19, %v419_v19  ;;  %v888_v33 = vsel %vm141_vm2, %v883_v31, 0 }
 0x37b   :  { %1279 = vmatpush3.bf16.msra.mxu0 %v427_v18  ;;  %1280 = vmatprep.mubr.msk.bf16.mxu0 %vm1489_vm0, %v1488_v0 }
 0x37c   :  { %1290 = vmatprep.subr.bf16.mxu0 %v1488_v0 }
 0x37d   :  { %v993_v34 = vpop.permute.xlu0 %992 }
 0x37e   :  { %v998_v36 = vsel %vm141_vm2, %v993_v34, 0 }
 0x382   :  { %1281 = vmatmul.mubr.msk.bf16.vlgmr.msra.gmra.mxu0 %vm141_vm2, %v420_v21 }
 0x383   :  { %1291 = vmatpush3.bf16.msra.mxu0 %v537_v22  ;;  %1292 = vmatprep.mubr.msk.bf16.mxu0 %vm1489_vm0, %v1488_v0  ;;  %v1383_v22 = vld [vmem:[#allocation6 + $0x8] sm:$0xff]  }
 0x384   :  { %1304 = vmatprep.subr.bf16.mxu0 %v1488_v0  ;;  %1297 = vmatpush3.bf16.msra.mxu1 %v1383_v22 }
 0x385   :  { %1298 = vmatprep.subr.bf16.mxu1 %v1488_v0 }
 0x39a   :  { %v527_v23 = vpop.xlane.xlu1 %526 }
 0x39b   :  { %1399 = vrcp.f32 %v527_v23  ;;  %v1384_v23 = vld [vmem:[#allocation6] sm:$0xff]  }
 0x39c   :  { %1299 = vmatpush3.bf16.msra.mxu1 %v1384_v23 }
 0x39d   :  { %1310 = vmatprep.subr.bf16.mxu1 %v1488_v0 }
 0x39e   :  { %v663_v26 = vpop.permute.xlu1 %662 }
 0x39f   :  { %v668_v28 = vsel %vm141_vm2, %v663_v26, 0 }
 0x3a2   :  { %v771_v32 = vpop.permute.xlu1 %770 }
 0x3a6   :  { %v881_v35 = vpop.permute.xlu1 %880 }
 0x3a8   :  { %v1400_v24 = vpop.eup %1399 }
 0x3a9   :  { %v529_v25 = vmul.f32 %v1400_v24, %v1392_v1 }
 0x3aa   :  { %v991_v37 = vpop.permute.xlu1 %990 }
 0x3ab   :  { %v530_v27 = vpack.c.bf16 %v529_v25, %v529_v25 }
 0x3ad   :  { %1293 = vmatmul.mubr.msk.bf16.vlgmr.msra.gmra.mxu0 %vm141_vm2, %v530_v27 }
 0x3ae   :  { %1305 = vmatpush3.bf16.xpose.msra.mxu0 %v668_v28  ;;  %1306 = vmatprep.mubr.msk.bf16.mxu0 %vm1489_vm0, %v1488_v0 }
 0x3af   :  { %1316 = vmatprep.subr.bf16.mxu0 %v1488_v0 }
 0x3b5   :  { %1307 = vmatmul.mubr.msk.bf16.vlgmr.msra.gmra.mxu0 %vm141_vm2, %v1616_v62 }
 0x3b6   :  { %1317 = vmatpush3.bf16.xpose.msra.mxu0 %v778_v30  ;;  %1318 = vmatprep.mubr.msk.bf16.mxu0 %vm1489_vm0, %v1488_v0 }
 0x3b7   :  { %1328 = vmatprep.subr.bf16.mxu0 %v1488_v0 }
 0x3bd   :  { %1319 = vmatmul.mubr.msk.bf16.vlgmr.msra.gmra.mxu0 %vm141_vm2, %v771_v32 }
 0x3be   :  { %1329 = vmatpush3.bf16.xpose.msra.mxu0 %v888_v33  ;;  %1330 = vmatprep.mubr.msk.bf16.mxu0 %vm1489_vm0, %v1488_v0 }
 0x3bf   :  { %1340 = vmatprep.subr.bf16.mxu0 %v1488_v0 }
 0x3c5   :  { %1331 = vmatmul.mubr.msk.bf16.vlgmr.msra.gmra.mxu0 %vm141_vm2, %v881_v35 }
 0x3c6   :  { %1341 = vmatpush3.bf16.xpose.msra.mxu0 %v998_v36  ;;  %1342 = vmatprep.mubr.msk.bf16.mxu0 %vm1489_vm0, %v1488_v0 }
 0x3c7   :  { %1352 = vmatprep.subr.bf16.mxu0 %v1488_v0 }
 0x3cd   :  { %1343 = vmatmul.mubr.msk.bf16.vlgmr.msra.gmra.mxu0 %vm141_vm2, %v991_v37 }
 0x3ce   :  { %1356 = vmatprep.mubr.msk.bf16.mxu0 %vm1489_vm0, %v1488_v0  ;;  %1353 = vmatpush3.bf16.msra.mxu0 %v1383_v22 }
 0x3cf   :  { %1354 = vmatprep.subr.bf16.mxu0 %v1488_v0 }
 0x3d2   :  { %1355 = vmatpush3.bf16.msra.mxu0 %v1384_v23 }
 0x432   :  { %v1674_v38 = vpop.f32.mrf.mxu0 }
 0x434   :  { %v1258_v39 = vpop.f32.mrf.mxu0 }
 0x436   :  { %v246_v40 = vpop.f32.mrf.mxu0 }
 0x438   :  { %v1259_v41 = vpop.f32.mrf.mxu0 }
 0x43a   :  { %v1676_v42 = vpop.f32.mrf.mxu0 }
 0x43c   :  { %v1270_v43 = vpop.f32.mrf.mxu0 }
 0x43e   :  { %v356_v44 = vpop.f32.mrf.mxu0 }
 0x440   :  { %v1271_v45 = vpop.f32.mrf.mxu0 }
 0x442   :  { %v463_v46 = vpop.f32.mrf.mxu0 }
 0x444   :  { %v1282_v47 = vpop.f32.mrf.mxu0 }
 0x446   :  { %v466_v48 = vpop.f32.mrf.mxu0 }
 0x448   :  { %v1283_v49 = vpop.f32.mrf.mxu0 }
 0x46d   :  { %v573_v50 = vpop.f32.mrf.mxu0 }
 0x46f   :  { %v1294_v51 = vpop.f32.mrf.mxu0 }
 0x471   :  { %v576_v52 = vpop.f32.mrf.mxu0 }
 0x473   :  { %v1295_v53 = vpop.f32.mrf.mxu0 }
 0x475   :  { %v704_v54 = vpop.f32.mrf.mxu0 }
 0x476   :  { %v710_v55 = vsel %vm141_vm2, %v704_v54, -inf }
 0x477   :  { %711 = vmax.xlane.f32.xlu0 %v710_v55  ;;  %v1308_v56 = vpop.f32.mrf.mxu0 }
 0x479   :  { %v707_v57 = vpop.f32.mrf.mxu0 }
 0x47b   :  { %v1309_v58 = vpop.f32.mrf.mxu0 }
 0x47d   :  { %v814_v59 = vpop.f32.mrf.mxu0 }
 0x47e   :  { %v820_v60 = vsel %vm141_vm2, %v814_v59, -inf }
 0x47f   :  { %821 = vmax.xlane.f32.xlu1 %v820_v60  ;;  %v1320_v61 = vpop.f32.mrf.mxu0 }
 0x481   :  { %v817_v63 = vpop.f32.mrf.mxu0 }
 0x483   :  { %v1321_v1 = vpop.f32.mrf.mxu0 }
 0x485   :  { %v924_v2 = vpop.f32.mrf.mxu0 }
 0x486   :  { %v930_v3 = vsel %vm141_vm2, %v924_v2, -inf }
 0x487   :  { %931 = vmax.xlane.f32.xlu0 %v930_v3  ;;  %v1332_v4 = vpop.f32.mrf.mxu0 }
 0x489   :  { %v927_v5 = vpop.f32.mrf.mxu0 }
 0x48b   :  { %v1333_v6 = vpop.f32.mrf.mxu0 }
 0x48d   :  { %v1034_v7 = vpop.f32.mrf.mxu0 }
 0x48e   :  { %v1040_v8 = vsel %vm141_vm2, %v1034_v7, -inf }
 0x48f   :  { %1041 = vmax.xlane.f32.xlu0 %v1040_v8  ;;  %v1344_v9 = vpop.f32.mrf.mxu0 }
 0x491   :  { %v1037_v10 = vpop.f32.mrf.mxu0 }
 0x493   :  { %v1345_v11 = vpop.f32.mrf.mxu0 }
 0x500   :  { %v712_v12 = vpop.xlane.xlu0 %711 }
 0x501   :  { %v713_v13 = vsub.f32 %v704_v54, %v712_v12 }
 0x503   :  { %v714_v14 = vmul.f32 1.442695, %v713_v13 }
 0x505   :  { %1401 = vpow2.f32 %v714_v14 }
 0x508   :  { %v822_v15 = vpop.xlane.xlu1 %821 }
 0x509   :  { %v823_v16 = vsub.f32 %v814_v59, %v822_v15 }
 0x50b   :  { %v824_v17 = vmul.f32 1.442695, %v823_v16 }
 0x50d   :  { %1403 = vpow2.f32 %v824_v17 }
 0x510   :  { %v932_v24 = vpop.xlane.xlu0 %931 }
 0x511   :  { %v933_v25 = vsub.f32 %v924_v2, %v932_v24  ;;  %v1185_v2 = vld [vmem:[%s1749_s4] ss:$0 sm:$0xff] }
 0x512   :  { %v1402_v18 = vpop.eup %1401 }
 0x513   :  { %v716_v19 = vsel %vm141_vm2, %v1402_v18, 0.0  ;;  %v934_v27 = vmul.f32 1.442695, %v933_v25 }
 0x514   :  { %717 = vadd.xlane.f32.xlu1 %v716_v19 }
 0x515   :  { %1405 = vpow2.f32 %v934_v27 }
 0x518   :  { %v1042_v26 = vpop.xlane.xlu0 %1041 }
 0x519   :  { %v1043_v28 = vsub.f32 %v1034_v7, %v1042_v26 }
 0x51a   :  { %v1683_v20 = vpop.eup %1403 }
 0x51b   :  { %v826_v21 = vsel %vm141_vm2, %v1683_v20, 0.0  ;;  %v1044_v29 = vmul.f32 1.442695, %v1043_v28 }
 0x51c   :  { %827 = vadd.xlane.f32.xlu0 %v826_v21 }
 0x51d   :  { %1407 = vpow2.f32 %v1044_v29 }
 0x522   :  { %v1406_v30 = vpop.eup %1405 }
 0x523   :  { %v936_v31 = vsel %vm141_vm2, %v1406_v30, 0.0 }
 0x525   :  { %584 = vrot.lane.b32.xlu1 %v463_v46, %s1500_s20 }
 0x529   :  { %588 = vrot.lane.b32.xlu1 %v573_v50, %s1501_s22 }
 0x52a   :  { %v1408_v32 = vpop.eup %1407 }
 0x52b   :  { %v1046_v33 = vsel %vm141_vm2, %v1408_v32, 0.0 }
 0x532   :  { %580 = vrot.lane.b32.xlu0 %v1676_v42, %s1486_s29 }
 0x54d   :  { %937 = vadd.xlane.f32.xlu1 %v936_v31 }
 0x551   :  { %1047 = vadd.xlane.f32.xlu0 %v1046_v33 }
 0x55e   :  { %722 = vrot.lane.b32.xlu1 %v1616_v62, %s1482_s21 }
 0x562   :  { %832 = vrot.lane.b32.xlu1 %v1616_v62, %s1497_s17 }
 0x566   :  { %942 = vrot.lane.b32.xlu1 %v1616_v62, %s1498_s18 }
 0x56a   :  { %1052 = vrot.lane.b32.xlu1 %v1616_v62, %s1499_s19 }
 0x59d   :  { %v718_v34 = vpop.xlane.xlu1 %717 }
 0x59e   :  { %1409 = vrcp.f32 %v718_v34 }
 0x5a1   :  { %v585_v35 = vpop.permute.xlu1 %584 }
 0x5a5   :  { %v828_v36 = vpop.xlane.xlu0 %827  ;;  %v589_v40 = vpop.permute.xlu1 %588 }
 0x5a6   :  { %1411 = vrcp.f32 %v828_v36 }
 0x5a9   :  { %v581_v37 = vpop.permute.xlu0 %580 }
 0x5aa   :  { %v591_v39 = vsel %vm141_vm2, %v1674_v38, %v581_v37 }
 0x5ab   :  { %v593_v41 = vsel %vm592_vm4, %v591_v39, %v585_v35  ;;  %v1410_v62 = vpop.eup %1409 }
 0x5ac   :  { %v595_v42 = vsel %vm594_vm5, %v593_v41, %v589_v40  ;;  %v720_v45 = vmul.f32 %v1410_v62, %v1402_v18 }
 0x5ad   :  { %v596_v43 = vpack.c.bf16 %v595_v42, %v595_v42 }
 0x5ae   :  { %v721_v47 = vpack.c.bf16 %v720_v45, %v720_v45 }
 0x5af   :  { %1301 = vmatmul.mubr.msk.bf16.vlgmr.msra.gmra.mxu1 %vm88_vm1, %v596_v43 }
 0x5b0   :  { %1312 = vmatprep.mubr.msk.bf16.mxu1 %vm1489_vm0, %v1488_v0 }
 0x5b3   :  { %v1412_v48 = vpop.eup %1411 }
 0x5b4   :  { %v830_v52 = vmul.f32 %v1412_v48, %v1683_v20 }
 0x5b6   :  { %v831_v54 = vpack.c.bf16 %v830_v52, %v830_v52 }
 0x5d6   :  { %v938_v44 = vpop.xlane.xlu1 %937 }
 0x5d7   :  { %1413 = vrcp.f32 %v938_v44 }
 0x5da   :  { %v723_v46 = vpop.permute.xlu1 %722  ;;  %v1048_v49 = vpop.xlane.xlu0 %1047 }
 0x5db   :  { %v728_v38 = vsel %vm205_vm3, %v723_v46, 0  ;;  %1415 = vrcp.f32 %v1048_v49 }
 0x5dc   :  { %1311 = vmatpush3.bf16.msra.mxu1 %v728_v38 }
 0x5dd   :  { %1322 = vmatprep.subr.bf16.mxu1 %v1488_v0 }
 0x5de   :  { %v833_v50 = vpop.permute.xlu1 %832 }
 0x5df   :  { %v838_v51 = vsel %vm205_vm3, %v833_v50, 0  ;;  %1313 = vmatmul.mubr.msk.bf16.vlgmr.msra.gmra.mxu1 %vm141_vm2, %v721_v47 }
 0x5e0   :  { %1323 = vmatpush3.bf16.msra.mxu1 %v838_v51  ;;  %1324 = vmatprep.mubr.msk.bf16.mxu1 %vm1489_vm0, %v1488_v0 }
 0x5e1   :  { %1334 = vmatprep.subr.bf16.mxu1 %v1488_v0 }
 0x5e2   :  { %v943_v53 = vpop.permute.xlu1 %942 }
 0x5e3   :  { %v948_v56 = vsel %vm205_vm3, %v943_v53, 0 }
 0x5e4   :  { %v1414_v55 = vpop.eup %1413 }
 0x5e5   :  { %v940_v57 = vmul.f32 %v1414_v55, %v1406_v30 }
 0x5e6   :  { %v1053_v58 = vpop.permute.xlu1 %1052 }
 0x5e7   :  { %1325 = vmatmul.mubr.msk.bf16.vlgmr.msra.gmra.mxu1 %vm141_vm2, %v831_v54  ;;  %v941_v59 = vpack.c.bf16 %v940_v57, %v940_v57  ;;  %v1058_v61 = vsel %vm205_vm3, %v1053_v58, 0 }
 0x5e8   :  { %1335 = vmatpush3.bf16.msra.mxu1 %v948_v56  ;;  %1336 = vmatprep.mubr.msk.bf16.mxu1 %vm1489_vm0, %v1488_v0  ;;  %v1416_v60 = vpop.eup %1415 }
 0x5e9   :  { %1346 = vmatprep.subr.bf16.mxu1 %v1488_v0  ;;  %v1050_v63 = vmul.f32 %v1416_v60, %v1408_v32 }
 0x5eb   :  { %v1051_v1 = vpack.c.bf16 %v1050_v63, %v1050_v63 }
 0x5ef   :  { %1337 = vmatmul.mubr.msk.bf16.vlgmr.msra.gmra.mxu1 %vm141_vm2, %v941_v59 }
 0x5f0   :  { %1347 = vmatpush3.bf16.msra.mxu1 %v1058_v61  ;;  %1348 = vmatprep.mubr.msk.bf16.mxu1 %vm1489_vm0, %v1488_v0 }
 0x5f7   :  { %1349 = vmatmul.mubr.msk.bf16.vlgmr.msra.gmra.mxu1 %vm141_vm2, %v1051_v1 }
 0x66f   :  { %v653_v3 = vpop.f32.mrf.mxu1 }
 0x670   :  { %v654_v4 = vadd.f32 %v1185_v2, %v653_v3 }
 0x671   :  { %v1302_v5 = vpop.f32.mrf.mxu1 }
 0x672   :  { %659 = vst [vmem:[%s1750_s5] sm:$0xff] %v654_v4 }
 0x673   :  { %v656_v6 = vpop.f32.mrf.mxu1 }
 0x675   :  { %v1303_v7 = vpop.f32.mrf.mxu1 }
 0x69f   :  { %v764_v8 = vpop.f32.mrf.mxu1 }
 0x6a1   :  { %v1314_v9 = vpop.f32.mrf.mxu1 }
 0x6a3   :  { %v767_v0 = vpop.f32.mrf.mxu1 }
 0x6a5   :  { %v1315_v10 = vpop.f32.mrf.mxu1 }
 0x6a7   :  { %v874_v11 = vpop.f32.mrf.mxu1 }
 0x6a8   :  { %1101 = vrot.lane.b32.xlu1 %v874_v11, %s1486_s29 }
 0x6a9   :  { %v1326_v12 = vpop.f32.mrf.mxu1 }
 0x6ab   :  { %v877_v13 = vpop.f32.mrf.mxu1 }
 0x6ad   :  { %v1327_v14 = vpop.f32.mrf.mxu1 }
 0x6af   :  { %v984_v15 = vpop.f32.mrf.mxu1 }
 0x6b0   :  { %1105 = vrot.lane.b32.xlu1 %v984_v15, %s1500_s20 }
 0x6b1   :  { %v1338_v16 = vpop.f32.mrf.mxu1 }
 0x6b3   :  { %v987_v17 = vpop.f32.mrf.mxu1 }
 0x6b5   :  { %v1339_v18 = vpop.f32.mrf.mxu1 }
 0x6b7   :  { %v1094_v19 = vpop.f32.mrf.mxu1 }
 0x6b8   :  { %1109 = vrot.lane.b32.xlu1 %v1094_v19, %s1501_s22 }
 0x6b9   :  { %v1350_v20 = vpop.f32.mrf.mxu1 }
 0x6bb   :  { %v1097_v21 = vpop.f32.mrf.mxu1 }
 0x6bd   :  { %v1351_v22 = vpop.f32.mrf.mxu1 }
 0x71a   :  { %v1102_v23 = vpop.permute.xlu1 %1101 }
 0x71b   :  { %v1112_v25 = vsel %vm141_vm2, %v764_v8, %v1102_v23 }
 0x722   :  { %v1106_v24 = vpop.permute.xlu1 %1105 }
 0x723   :  { %v1113_v26 = vsel %vm592_vm4, %v1112_v25, %v1106_v24 }
 0x72a   :  { %v1110_v27 = vpop.permute.xlu1 %1109 }
 0x72b   :  { %v1114_v28 = vsel %vm594_vm5, %v1113_v26, %v1110_v27 }
 0x72c   :  { %v1115_v29 = vpack.c.bf16 %v1114_v28, %v1114_v28 }
 0x72e   :  { %1357 = vmatmul.mubr.msk.bf16.vlgmr.msra.gmra.mxu0 %vm88_vm1, %v1115_v29 }
 0x7ee   :  { %v1160_v30 = vpop.f32.mrf.mxu0 }
 0x7ef   :  { %v1161_v31 = vadd.f32 %v1185_v2, %v1160_v30 }
 0x7f0   :  { %v1358_v32 = vpop.f32.mrf.mxu0 }
 0x7f1   :  { %1166 = vst [vmem:[%s1750_s5 + $0x8] sm:$0xff] %v1161_v31 }
 0x7f2   :  { %v1163_v33 = vpop.f32.mrf.mxu0 }
 0x7f4   :  { %v1359_v34 = vpop.f32.mrf.mxu0 }
 0x7f5   :  { %1171 = vsyncpa [#allocation3], 1 }
 0x7f6   :  { %1172 = vsyncpa [#allocation5], 1 }

</bundles_post_ra>
